<compile_context>
chip_gen: v5e
topology: v5e:2x2
jax: 0.10.0
libtpu: 0.0.40
codegen_flags: <defaults>
</compile_context>

<pallas_src>
import functools

import jax
import jax.numpy as jnp
from jax import lax
from jax.experimental import pallas as pl
from jax.experimental.pallas import tpu as pltpu


# ----------------------------------------------------------------------------
# Shared kernel tail: mean over tokens, BN-folded FC matmul, log_softmax.
# ----------------------------------------------------------------------------
def _finish_block(xlen_ref, wt_ref, b_ref, acc_ref, out_ref):
    # TODO(synk): dropout path (use_dropout > 0) omitted -- identity in eval mode.
    inv_len = pl.reciprocal(xlen_ref[...], approx=False)          # (TB, 1)
    embed = acc_ref[...] * inv_len                                 # (TB, D)

    # BN (eval) already folded into wt_ref / b_ref -> single MXU matmul.
    logits = jnp.dot(embed, wt_ref[...],
                     preferred_element_type=jnp.float32) + b_ref[...]   # (TB, CP)

    # log_softmax over classes (padded lanes carry -1e30 bias -> exp() == 0).
    m = jnp.max(logits, axis=1, keepdims=True)
    z = logits - m
    lse = jnp.log(jnp.sum(jnp.exp(z), axis=1, keepdims=True))
    out_ref[...] = z - lse


# ----------------------------------------------------------------------------
# Fast path: embedding table resident in VMEM, gather via dynamic slice loads.
# ----------------------------------------------------------------------------
def fasttext_resident_kernel(ids_smem, xlen_ref, embed_ref, wt_ref, b_ref,
                             out_ref, acc_ref, *, L, V):
    """ids_smem : SMEM (B*L,) int32 (scalar-prefetched, flattened)
       xlen_ref : VMEM (TB, 1) f32
       embed_ref: VMEM (V, D) f32   (resident: constant index_map, DMA'd once)
       wt_ref   : VMEM (D, CP) f32  (BN-folded, transposed, lane-padded)
       b_ref    : VMEM (1, CP) f32  (BN-folded bias; padded lanes = -1e30)
       out_ref  : VMEM (TB, CP) f32
       acc_ref  : VMEM (TB, D) f32 scratch
    """
    i = pl.program_id(0)
    TB, D = acc_ref.shape
    base = i * TB * L

    def per_row(b, carry):
        row_base = base + b * L

        def tok(t, acc):
            # clip only guards malformed ids (OOB would be an error in torch).
            rid = jnp.clip(ids_smem[row_base + t], 0, V - 1)
            return acc + embed_ref[pl.ds(rid, 1), :]               # (1, D) load

        row_sum = lax.fori_loop(0, L, tok, jnp.zeros((1, D), jnp.float32),
                                unroll=min(L, 8))
        acc_ref[pl.ds(b, 1), :] = row_sum                          # one store/row
        return carry

    lax.fori_loop(0, TB, per_row, 0)
    _finish_block(xlen_ref, wt_ref, b_ref, acc_ref, out_ref)


# ----------------------------------------------------------------------------
# Fallback path: table stays in HBM; 8-deep DMA row-gather into a per-row
# staging buffer, then one reduction + one store per batch row.
# ----------------------------------------------------------------------------
def fasttext_hbm_kernel(ids_smem, xlen_ref, embed_hbm, wt_ref, b_ref,
                        out_ref, acc_ref, stage_ref, sem, *, L, V, depth):
    """embed_hbm: HBM (V, D) f32 (manual DMA row gather)
       stage_ref: VMEM (L, 1, D) f32 staging buffer (leading dim is untiled)
       sem      : DMA semaphores (depth,)
    """
    i = pl.program_id(0)
    TB, D = acc_ref.shape
    base = i * TB * L
    n_prime = min(depth, L)

    def read_id(idx):
        return jnp.clip(ids_smem[idx], 0, V - 1)

    def make_copy(rid, stage_row, slot):
        return pltpu.make_async_copy(embed_hbm.at[pl.ds(rid, 1), :],
                                     stage_ref.at[stage_row],
                                     sem.at[slot])

    def per_row(b, carry):
        row_base = base + b * L

        # Prime the ring: up to `depth` row fetches in flight at once.
        def prime(t, c):
            make_copy(read_id(row_base + t), t, t % depth).start()
            return c

        lax.fori_loop(0, n_prime, prime, 0)

        def body(t, c):
            nxt = t + n_prime
            # Read SMEM ids *before* the wait (.wait() breaks sst->sld
            # forwarding), and reconstruct the wait with the same src/dst
            # slices that were started.
            rid_cur = read_id(row_base + t)
            rid_nxt = read_id(row_base + jnp.minimum(nxt, L - 1))
            make_copy(rid_cur, t, t % depth).wait()

            @pl.when(nxt < L)
            def _():
                make_copy(rid_nxt, nxt, nxt % depth).start()

            return c

        lax.fori_loop(0, L, body, 0)

        # Single reduction + single store per batch row (no per-token RMW).
        acc_ref[pl.ds(b, 1), :] = jnp.sum(stage_ref[...], axis=0)   # (1, D)
        return carry

    lax.fori_loop(0, TB, per_row, 0)
    _finish_block(xlen_ref, wt_ref, b_ref, acc_ref, out_ref)


# ----------------------------------------------------------------------------
# Wrapper
# ----------------------------------------------------------------------------
def _vmem_capacity_bytes():
    try:
        return int(pltpu.get_tpu_info().vmem_capacity_bytes)
    except Exception:
        return 64 * 1024 * 1024      # conservative (v7x per-core VMEM)


def _pick_tb(B, resident):
    """Batch tile.  Guarantees >= 2 grid steps when B >= 16 so v7x's second
    TensorCore gets work; caps the tile so the MXU M dimension is well fed on
    the resident (matmul-visible) path."""
    if B < 16:
        return B
    cap = min(256 if resident else 64, B // 2)
    cap -= cap % 8
    for tb in range(cap, 7, -8):          # multiples of 8, descending
        if B % tb == 0:
            return tb
    return B                               # no clean divisor: single full block


@functools.partial(jax.jit, static_argnames=("force_hbm_gather",))
def fasttext_forward(ids, x_len, embed_table, gamma, beta, run_mean, run_var,
                     w, b, force_hbm_gather=False):
    B, L = ids.shape
    V, D = embed_table.shape
    C = w.shape[0]
    CP = pl.cdiv(C, 128) * 128            # lane-dense padded class dim

    # --- fold BatchNorm (eval) into the FC layer, pre-transpose to (D, C) ---
    eps = 1e-5
    scale = gamma * jax.lax.rsqrt(run_var + eps)                   # (1, D)
    w_folded = w * scale                                           # (C, D)
    b_folded = b + (beta - run_mean * scale) @ w.T                 # (1, C)
    wt_pad = jnp.zeros((D, CP), jnp.float32).at[:, :C].set(w_folded.T)
    b_pad = jnp.full((1, CP), -1e30, jnp.float32).at[:, :C].set(b_folded)

    # Padding tokens (id 0) are summed exactly like in torch: the module keeps
    # row 0 of nn.Embedding(padding_idx=0) at zero, so no masking is needed.
    ids_flat = ids.reshape(-1).astype(jnp.int32)                   # 1-D for SMEM
    # TODO(synk): for very large B*L, block ids per-tile into SMEM instead of
    # scalar-prefetching the whole flattened array (SMEM capacity).
    xlen2d = x_len.astype(jnp.float32).reshape(B, 1)

    # --- generation-aware residency gate (all sizes are static Python ints) --
    vmem_cap = _vmem_capacity_bytes()
    budget = (vmem_cap * 3) // 4          # ~48 MiB on v7x, ~96 MiB on v5e/v6e
    table_bytes = V * D * 4
    weight_bytes = (D * CP + CP) * 4
    tiles_bound = 2 * 256 * (CP + 1) * 4 + 256 * D * 4
    resident = (not force_hbm_gather) and (
        2 * table_bytes + 2 * weight_bytes + tiles_bound + (4 << 20) <= budget)

    TB = _pick_tb(B, resident)
    nb = B // TB

    if resident:
        vmem_limit = max(32 << 20,
                         min(budget,
                             2 * table_bytes + 2 * weight_bytes
                             + 2 * TB * (CP + 1) * 4 + TB * D * 4 + (8 << 20)))
        kernel = functools.partial(fasttext_resident_kernel, L=L, V=V)
        in_specs = [
            pl.BlockSpec((TB, 1), lambda i, ids_ref: (i, 0)),      # x_len
            pl.BlockSpec((V, D), lambda i, ids_ref: (0, 0)),       # table (VMEM-resident)
            pl.BlockSpec((D, CP), lambda i, ids_ref: (0, 0)),      # folded W^T
            pl.BlockSpec((1, CP), lambda i, ids_ref: (0, 0)),      # folded bias
        ]
        scratch = [pltpu.VMEM((TB, D), jnp.float32)]               # accumulator
    else:
        # Explicit limit: v5e's default scoped VMEM is only 16 MiB.
        vmem_limit = 32 << 20
        depth = 8
        kernel = functools.partial(fasttext_hbm_kernel, L=L, V=V, depth=depth)
        in_specs = [
            pl.BlockSpec((TB, 1), lambda i, ids_ref: (i, 0)),      # x_len
            pl.BlockSpec(memory_space=pl.ANY),                     # table stays in HBM
            pl.BlockSpec((D, CP), lambda i, ids_ref: (0, 0)),      # folded W^T
            pl.BlockSpec((1, CP), lambda i, ids_ref: (0, 0)),      # folded bias
        ]
        scratch = [pltpu.VMEM((TB, D), jnp.float32),               # accumulator
                   pltpu.VMEM((L, 1, D), jnp.float32),             # row staging buffer
                   pltpu.SemaphoreType.DMA((depth,))]              # 8-deep gather ring

    out_pad = pl.pallas_call(
        kernel,
        out_shape=jax.ShapeDtypeStruct((B, CP), jnp.float32),
        grid_spec=pltpu.PrefetchScalarGridSpec(
            num_scalar_prefetch=1,
            grid=(nb,),
            in_specs=in_specs,
            out_specs=pl.BlockSpec((TB, CP), lambda i, ids_ref: (i, 0)),
            scratch_shapes=scratch,
        ),
        compiler_params=pltpu.CompilerParams(
            dimension_semantics=("parallel",),
            vmem_limit_bytes=int(vmem_limit),
        ),
    )(ids_flat, xlen2d, embed_table, wt_pad, b_pad)

    return out_pad[:, :C]


def reference_forward(ids, x_len, embed_table, gamma, beta, run_mean, run_var, w, b):
    emb = embed_table[ids]                                  # (B, L, D)
    s = jnp.sum(emb, axis=1) / x_len[:, None].astype(jnp.float32)
    inv_std = jax.lax.rsqrt(run_var + 1e-5)
    s = (s - run_mean) * inv_std * gamma + beta
    out = s @ w.T + b
    return jax.nn.log_softmax(out, axis=1)


if __name__ == "__main__":
    # config: vocab_size=64, embedding_dim=32, num_classes=8, use_bn=1, use_dropout=0
    B, L = 2, 8
    V, D, C = 64, 32, 8

    key = jax.random.PRNGKey(0)
    k_ids, k_len, k_emb, k_w, k_b = jax.random.split(key, 5)

    # token ids (keep some zeros to exercise padding_idx=0)
    ids = jax.random.randint(k_ids, (B, L), 0, V, dtype=jnp.int32)
    x_len = jax.random.randint(k_len, (B,), 1, L + 1).astype(jnp.float32)

    # embedding table ~ N(0,1), row 0 zeroed (nn.Embedding padding_idx=0 init)
    embed_table = jax.random.normal(k_emb, (V, D), dtype=jnp.float32)
    embed_table = embed_table.at[0].set(0.0)

    # fc: xavier_uniform_(weight, gain=1), uniform_(bias) in [0, 1)
    bound = (6.0 / (D + C)) ** 0.5
    w = jax.random.uniform(k_w, (C, D), minval=-bound, maxval=bound,
                           dtype=jnp.float32)
    b = jax.random.uniform(k_b, (1, C), dtype=jnp.float32)

    # BatchNorm1d defaults (eval mode): weight=1, bias=0, running stats 0/1
    gamma = jnp.ones((1, D), jnp.float32)
    beta = jnp.zeros((1, D), jnp.float32)
    run_mean = jnp.zeros((1, D), jnp.float32)
    run_var = jnp.ones((1, D), jnp.float32)

    ref = reference_forward(ids, x_len, embed_table, gamma, beta,
                            run_mean, run_var, w, b)

    # Fast path: table resident in VMEM (8 KiB table -> always resident here).
    out_fast = jax.block_until_ready(
        fasttext_forward(ids, x_len, embed_table, gamma, beta,
                         run_mean, run_var, w, b))
    assert out_fast.shape == (B, C)
    assert jnp.allclose(out_fast, ref, atol=1e-5, rtol=1e-5), (out_fast, ref)

    # Fallback path: force the HBM row-gather pipeline and validate it too.
    out_hbm = jax.block_until_ready(
        fasttext_forward(ids, x_len, embed_table, gamma, beta,
                         run_mean, run_var, w, b, force_hbm_gather=True))
    assert jnp.allclose(out_hbm, ref, atol=1e-5, rtol=1e-5), (out_hbm, ref)

    print("KERNEL_OK")
</pallas_src>

<mosaic_0001>
module attributes {stable_mosaic.version = 11 : i64} {
  func.func @fasttext_resident_kernel(%arg0: i32, %arg1: memref<16xi32, #tpu.memory_space<smem>>, %arg2: memref<2x1xf32, #tpu.memory_space<vmem>>, %arg3: memref<64x32xf32, #tpu.memory_space<vmem>>, %arg4: memref<32x128xf32, #tpu.memory_space<vmem>>, %arg5: memref<1x128xf32, #tpu.memory_space<vmem>>, %arg6: memref<2x128xf32, #tpu.memory_space<vmem>>, %arg7: memref<2x32xf32, #tpu.memory_space<vmem>>) attributes {dimension_semantics = [#tpu.dimension_semantics<parallel>], iteration_bounds = array<i64: 1>, scalar_prefetch = 1 : i64, scratch_operands = 1 : i64, tpu.core_type = #tpu.core_type<tc>, window_params = [{transform_indices = @transform_0, window_bounds = array<i64: 2, 1>}, {pipeline_mode = #tpu.pipeline_mode<synchronous>, transform_indices = @transform_1, window_bounds = array<i64: 64, 32>}, {pipeline_mode = #tpu.pipeline_mode<synchronous>, transform_indices = @transform_2, window_bounds = array<i64: 32, 128>}, {pipeline_mode = #tpu.pipeline_mode<synchronous>, transform_indices = @transform_3, window_bounds = array<i64: 1, 128>}, {transform_indices = @transform_4, window_bounds = array<i64: 2, 128>}]} {
    %c2_i32 = arith.constant 2 : i32
    %0 = arith.muli %arg0, %c2_i32 : i32
    %c8_i32 = arith.constant 8 : i32
    %1 = arith.muli %0, %c8_i32 : i32
    %c0_i32 = arith.constant 0 : i32
    %c2_i32_0 = arith.constant 2 : i32
    %2 = arith.addi %c0_i32, %c2_i32_0 : i32
    %c1_i32 = arith.constant 1 : i32
    scf.for %arg8 = %c0_i32 to %2 step %c1_i32  : i32 {
      %c8_i32_13 = arith.constant 8 : i32
      %24 = arith.muli %arg8, %c8_i32_13 : i32
      %25 = arith.addi %1, %24 : i32
      %cst_14 = arith.constant 0.000000e+00 : f32
      %26 = vector.broadcast %cst_14 : f32 to vector<1x32xf32>
      %c0_i32_15 = arith.constant 0 : i32
      %27 = arith.addi %25, %c0_i32_15 : i32
      %28 = arith.index_cast %27 : i32 to index
      %29 = memref.load %arg1[%28] : memref<16xi32, #tpu.memory_space<smem>>
      %c0_i32_16 = arith.constant 0 : i32
      %c63_i32 = arith.constant 63 : i32
      %30 = arith.maxsi %c0_i32_16, %29 : i32
      %31 = arith.minsi %c63_i32, %30 : i32
      %32 = arith.index_cast %31 : i32 to index
      %c0_17 = arith.constant 0 : index
      %33 = vector.load %arg3[%32, %c0_17] : memref<64x32xf32, #tpu.memory_space<vmem>>, vector<1x32xf32>
      %34 = arith.addf %26, %33 : vector<1x32xf32>
      %c1_i32_18 = arith.constant 1 : i32
      %35 = arith.addi %25, %c1_i32_18 : i32
      %36 = arith.index_cast %35 : i32 to index
      %37 = memref.load %arg1[%36] : memref<16xi32, #tpu.memory_space<smem>>
      %c0_i32_19 = arith.constant 0 : i32
      %c63_i32_20 = arith.constant 63 : i32
      %38 = arith.maxsi %c0_i32_19, %37 : i32
      %39 = arith.minsi %c63_i32_20, %38 : i32
      %40 = arith.index_cast %39 : i32 to index
      %c0_21 = arith.constant 0 : index
      %41 = vector.load %arg3[%40, %c0_21] : memref<64x32xf32, #tpu.memory_space<vmem>>, vector<1x32xf32>
      %42 = arith.addf %34, %41 : vector<1x32xf32>
      %c2_i32_22 = arith.constant 2 : i32
      %43 = arith.addi %25, %c2_i32_22 : i32
      %44 = arith.index_cast %43 : i32 to index
      %45 = memref.load %arg1[%44] : memref<16xi32, #tpu.memory_space<smem>>
      %c0_i32_23 = arith.constant 0 : i32
      %c63_i32_24 = arith.constant 63 : i32
      %46 = arith.maxsi %c0_i32_23, %45 : i32
      %47 = arith.minsi %c63_i32_24, %46 : i32
      %48 = arith.index_cast %47 : i32 to index
      %c0_25 = arith.constant 0 : index
      %49 = vector.load %arg3[%48, %c0_25] : memref<64x32xf32, #tpu.memory_space<vmem>>, vector<1x32xf32>
      %50 = arith.addf %42, %49 : vector<1x32xf32>
      %c3_i32 = arith.constant 3 : i32
      %51 = arith.addi %25, %c3_i32 : i32
      %52 = arith.index_cast %51 : i32 to index
      %53 = memref.load %arg1[%52] : memref<16xi32, #tpu.memory_space<smem>>
      %c0_i32_26 = arith.constant 0 : i32
      %c63_i32_27 = arith.constant 63 : i32
      %54 = arith.maxsi %c0_i32_26, %53 : i32
      %55 = arith.minsi %c63_i32_27, %54 : i32
      %56 = arith.index_cast %55 : i32 to index
      %c0_28 = arith.constant 0 : index
      %57 = vector.load %arg3[%56, %c0_28] : memref<64x32xf32, #tpu.memory_space<vmem>>, vector<1x32xf32>
      %58 = arith.addf %50, %57 : vector<1x32xf32>
      %c4_i32 = arith.constant 4 : i32
      %59 = arith.addi %25, %c4_i32 : i32
      %60 = arith.index_cast %59 : i32 to index
      %61 = memref.load %arg1[%60] : memref<16xi32, #tpu.memory_space<smem>>
      %c0_i32_29 = arith.constant 0 : i32
      %c63_i32_30 = arith.constant 63 : i32
      %62 = arith.maxsi %c0_i32_29, %61 : i32
      %63 = arith.minsi %c63_i32_30, %62 : i32
      %64 = arith.index_cast %63 : i32 to index
      %c0_31 = arith.constant 0 : index
      %65 = vector.load %arg3[%64, %c0_31] : memref<64x32xf32, #tpu.memory_space<vmem>>, vector<1x32xf32>
      %66 = arith.addf %58, %65 : vector<1x32xf32>
      %c5_i32 = arith.constant 5 : i32
      %67 = arith.addi %25, %c5_i32 : i32
      %68 = arith.index_cast %67 : i32 to index
      %69 = memref.load %arg1[%68] : memref<16xi32, #tpu.memory_space<smem>>
      %c0_i32_32 = arith.constant 0 : i32
      %c63_i32_33 = arith.constant 63 : i32
      %70 = arith.maxsi %c0_i32_32, %69 : i32
      %71 = arith.minsi %c63_i32_33, %70 : i32
      %72 = arith.index_cast %71 : i32 to index
      %c0_34 = arith.constant 0 : index
      %73 = vector.load %arg3[%72, %c0_34] : memref<64x32xf32, #tpu.memory_space<vmem>>, vector<1x32xf32>
      %74 = arith.addf %66, %73 : vector<1x32xf32>
      %c6_i32 = arith.constant 6 : i32
      %75 = arith.addi %25, %c6_i32 : i32
      %76 = arith.index_cast %75 : i32 to index
      %77 = memref.load %arg1[%76] : memref<16xi32, #tpu.memory_space<smem>>
      %c0_i32_35 = arith.constant 0 : i32
      %c63_i32_36 = arith.constant 63 : i32
      %78 = arith.maxsi %c0_i32_35, %77 : i32
      %79 = arith.minsi %c63_i32_36, %78 : i32
      %80 = arith.index_cast %79 : i32 to index
      %c0_37 = arith.constant 0 : index
      %81 = vector.load %arg3[%80, %c0_37] : memref<64x32xf32, #tpu.memory_space<vmem>>, vector<1x32xf32>
      %82 = arith.addf %74, %81 : vector<1x32xf32>
      %c7_i32 = arith.constant 7 : i32
      %83 = arith.addi %25, %c7_i32 : i32
      %84 = arith.index_cast %83 : i32 to index
      %85 = memref.load %arg1[%84] : memref<16xi32, #tpu.memory_space<smem>>
      %c0_i32_38 = arith.constant 0 : i32
      %c63_i32_39 = arith.constant 63 : i32
      %86 = arith.maxsi %c0_i32_38, %85 : i32
      %87 = arith.minsi %c63_i32_39, %86 : i32
      %88 = arith.index_cast %87 : i32 to index
      %c0_40 = arith.constant 0 : index
      %89 = vector.load %arg3[%88, %c0_40] : memref<64x32xf32, #tpu.memory_space<vmem>>, vector<1x32xf32>
      %90 = arith.addf %82, %89 : vector<1x32xf32>
      %c8_i32_41 = arith.constant 8 : i32
      %91 = arith.index_cast %arg8 : i32 to index
      %c0_42 = arith.constant 0 : index
      %92 = vector.load %arg7[%91, %c0_42] : memref<2x32xf32, #tpu.memory_space<vmem>>, vector<1x32xf32>
      tpu.vector_store %arg7[%91, %c0_42], %90 {strides = array<i32>} : memref<2x32xf32, #tpu.memory_space<vmem>>, vector<1x32xf32>,
    }
    %c2_i32_1 = arith.constant 2 : i32
    %c0 = arith.constant 0 : index
    %c0_2 = arith.constant 0 : index
    %3 = vector.load %arg2[%c0, %c0_2] : memref<2x1xf32, #tpu.memory_space<vmem>>, vector<2x1xf32>
    %4 = tpu.reciprocal %3 : vector<2x1xf32> -> vector<2x1xf32>
    %c0_3 = arith.constant 0 : index
    %c0_4 = arith.constant 0 : index
    %5 = vector.load %arg7[%c0_3, %c0_4] : memref<2x32xf32, #tpu.memory_space<vmem>>, vector<2x32xf32>
    %6 = vector.broadcast %4 : vector<2x1xf32> to vector<2x32xf32>
    %7 = arith.mulf %5, %6 : vector<2x32xf32>
    %c0_5 = arith.constant 0 : index
    %c0_6 = arith.constant 0 : index
    %8 = vector.load %arg4[%c0_5, %c0_6] : memref<32x128xf32, #tpu.memory_space<vmem>>, vector<32x128xf32>
    %cst = arith.constant dense<0.000000e+00> : vector<2x128xf32>
    %9 = tpu.matmul %7, %8, %cst {dimension_numbers = #tpu.dot_dimension_numbers<[1], [0], [0], [1], [0, 0, 1, 1], [], []>} : vector<2x32xf32>, vector<32x128xf32>, vector<2x128xf32> -> vector<2x128xf32>
    %c0_7 = arith.constant 0 : index
    %c0_8 = arith.constant 0 : index
    %10 = vector.load %arg5[%c0_7, %c0_8] : memref<1x128xf32, #tpu.memory_space<vmem>>, vector<1x128xf32>
    %11 = vector.broadcast %10 : vector<1x128xf32> to vector<2x128xf32>
    %12 = arith.addf %9, %11 : vector<2x128xf32>
    %cst_9 = arith.constant dense<0xFF800000> : vector<2xf32>
    %13 = vector.multi_reduction <maximumf>, %12, %cst_9 [1] : vector<2x128xf32> to vector<2xf32>
    %14 = vector.shape_cast %13 : vector<2xf32> to vector<2x1xf32>
    %15 = vector.broadcast %14 : vector<2x1xf32> to vector<2x128xf32>
    %16 = arith.subf %12, %15 : vector<2x128xf32>
    %17 = math.exp %16 : vector<2x128xf32>
    %cst_10 = arith.constant dense<0.000000e+00> : vector<2xf32>
    %18 = vector.multi_reduction <add>, %17, %cst_10 [1] : vector<2x128xf32> to vector<2xf32>
    %19 = vector.shape_cast %18 : vector<2xf32> to vector<2x1xf32>
    %20 = math.log %19 : vector<2x1xf32>
    %21 = vector.broadcast %20 : vector<2x1xf32> to vector<2x128xf32>
    %22 = arith.subf %16, %21 : vector<2x128xf32>
    %c0_11 = arith.constant 0 : index
    %c0_12 = arith.constant 0 : index
    %23 = vector.load %arg6[%c0_11, %c0_12] : memref<2x128xf32, #tpu.memory_space<vmem>>, vector<2x128xf32>
    tpu.vector_store %arg6[%c0_11, %c0_12], %22 {strides = array<i32>} : memref<2x128xf32, #tpu.memory_space<vmem>>, vector<2x128xf32>,
    return
  }
  func.func @transform_0(%arg0: i32, %arg1: memref<16xi32, #tpu.memory_space<smem>>) -> (i32, i32) {
    %c0_i32 = arith.constant 0 : i32
    %c0_i32_0 = arith.constant 0 : i32
    return %arg0, %c0_i32 : i32, i32
  }
  func.func @transform_1(%arg0: i32, %arg1: memref<16xi32, #tpu.memory_space<smem>>) -> (i32, i32) {
    %c0_i32 = arith.constant 0 : i32
    %c0_i32_0 = arith.constant 0 : i32
    %c0_i32_1 = arith.constant 0 : i32
    return %c0_i32, %c0_i32_0 : i32, i32
  }
  func.func @transform_2(%arg0: i32, %arg1: memref<16xi32, #tpu.memory_space<smem>>) -> (i32, i32) {
    %c0_i32 = arith.constant 0 : i32
    %c0_i32_0 = arith.constant 0 : i32
    %c0_i32_1 = arith.constant 0 : i32
    return %c0_i32, %c0_i32_0 : i32, i32
  }
  func.func @transform_3(%arg0: i32, %arg1: memref<16xi32, #tpu.memory_space<smem>>) -> (i32, i32) {
    %c0_i32 = arith.constant 0 : i32
    %c0_i32_0 = arith.constant 0 : i32
    %c0_i32_1 = arith.constant 0 : i32
    return %c0_i32, %c0_i32_0 : i32, i32
  }
  func.func @transform_4(%arg0: i32, %arg1: memref<16xi32, #tpu.memory_space<smem>>) -> (i32, i32) {
    %c0_i32 = arith.constant 0 : i32
    %c0_i32_0 = arith.constant 0 : i32
    return %arg0, %c0_i32 : i32, i32
  }
}

</mosaic_0001>

<bundles_post_ra>
// kernel: fasttext_forward.1
= control target key start
LH: loop header
LB: loop body
LE: loop exit
PB: predicated region body
PF: predicated region fallthrough
CT: control target
= control target key end

     0   :  { %s333_s21 = smov [#allocation4]   ;;  %s446_s0 = inlined_call_operand.vmem [shape: s32[16], index: 0, kind: input, shape index: {}]   ;;  %s447_s1 = inlined_call_operand.vmem [shape: f32[2,1], index: 1, kind: input, shape index: {}]   ;;  %s448_s2 = inlined_call_operand.vmem [shape: f32[64,32], index: 2, kind: input, shape index: {}]   ;;  %s449_s3 = inlined_call_operand.vmem [shape: f32[32,128], index: 3, kind: input, shape index: {}]   ;;  %s450_s4 = inlined_call_operand.vmem [shape: f32[1,128], index: 4, kind: input, shape index: {}]   ;;  %s451_s5 = inlined_call_operand.hbm [shape: f32[2,128], index: 5, kind: output, shape index: {}]  }
   0x1   :  { %s11_s20 = sshll.u32 %s446_s0, 4  ;;  %s12_s20 = int_to_ptr.vmem [resolvable:$true] %s11_s20 }
   0x2   :  { %14 = dma.vmem_to_smem %s12_s20, 16, %s333_s21, [#allocation3] }
   0x3   :  { %325 = dma.done.wait [#allocation3], 16 }
   0x4   :  { %326 = vsyncadd [#allocation3], 4294967280 }
   0x5   :  { %17 = sfence }
   0x6   :  { %18 = vsyncpa [#allocation6], 0  ;;  %s369_s22 = smov 0  }
   0x7 LB: > { %s375_s23 = sshll.u32 %s331_s22, 3  ;;  %vm108_vm0 = vcmask 253952   ;;  %s107_s13 = scalar_lea.vmem [#allocation2], %s331_s22  ;;  %s331_s22 = sphi %s369_s22, %s33_s22  }
   0x8   : > { %s36_s0 = sld [smem:[#allocation4 + %s375_s23]]  ;;  %s44_s24 = sadd.s32 1, %s375_s23 }
   0x9   : > { %s45_s25 = sld [smem:[#allocation4 + %s44_s24]]  ;;  %s53_s26 = sadd.s32 2, %s375_s23 }
   0xa   : > { %s54_s27 = sld [smem:[#allocation4 + %s53_s26]]  ;;  %s62_s28 = sadd.s32 3, %s375_s23 }
   0xb   : > { %s63_s29 = sld [smem:[#allocation4 + %s62_s28]]  ;;  %s71_s30 = sadd.s32 4, %s375_s23 }
   0xc   : > { %s382_s6 = sld [smem:[#allocation4 + %s71_s30]]  ;;  %s80_s7 = sadd.s32 5, %s375_s23 }
   0xd   : > { %s385_s8 = sld [smem:[#allocation4 + %s80_s7]]  ;;  %s89_s9 = sadd.s32 6, %s375_s23 }
   0xe   : > { %p37_p0 = scmp.gt.s32.totalorder %s36_s0, 0  ;;  %p209_p1 = scmp.lt.s32.totalorder %s36_s0, 63 }
   0xf   : > { %p46_p2 = scmp.gt.s32.totalorder %s45_s25, 0  ;;  %p214_p3 = scmp.lt.s32.totalorder %s45_s25, 63 }
  0x10   : > { %s453_s0 = smov (!%p37_p0, %s36_s0), 0  ;;  %p55_p4 = scmp.gt.s32.totalorder %s54_s27, 0 }
  0x11   : > { %s455_s25 = smov (!%p46_p2, %s45_s25), 0  ;;  %s457_s0 = smov (!%p209_p1, %s453_s0), 63 }
  0x12   : > { %s459_s25 = smov (!%p214_p3, %s455_s25), 63  ;;  %s41_s12 = scalar_lea.vmem %s448_s2, %s457_s0 }
  0x13   : > { %s50_s15 = scalar_lea.vmem %s448_s2, %s459_s25  ;;  %p219_p5 = scmp.lt.s32.totalorder %s54_s27, 63  ;;  %v42_v0 = vld [vmem:[%s41_s12] sm:$0x1] }
  0x14   : > { %s461_s27 = smov (!%p55_p4, %s54_s27), 0  ;;  %p64_p6 = scmp.gt.s32.totalorder %s63_s29, 0  ;;  %v51_v1 = vld [vmem:[%s50_s15] sm:$0x1] }
  0x15   : > { %p224_p7 = scmp.lt.s32.totalorder %s63_s29, 63  ;;  %s463_s27 = smov (!%p219_p5, %s461_s27), 63  ;;  %v52_v2 = vadd.f32 %v51_v1, %v42_v0 }
  0x16   : > { %s465_s29 = smov (!%p64_p6, %s63_s29), 0  ;;  %s59_s18 = scalar_lea.vmem %s448_s2, %s463_s27 }
  0x17   : > { %p73_p8 = scmp.gt.s32.totalorder %s382_s6, 0  ;;  %s467_s29 = smov (!%p224_p7, %s465_s29), 63  ;;  %v60_v3 = vld [vmem:[%s59_s18] sm:$0x1] }
  0x18   : > { %s68_s0 = scalar_lea.vmem %s448_s2, %s467_s29  ;;  %p229_p9 = scmp.lt.s32.totalorder %s382_s6, 63  ;;  %v61_v4 = vadd.f32 %v60_v3, %v52_v2 }
  0x19   : > { %s74_s19 = scalar_select %p73_p8, %s382_s6, 0  ;;  %v69_v5 = vld [vmem:[%s68_s0] sm:$0x1] }
  0x1a   : > { %p82_p10 = scmp.gt.s32.totalorder %s385_s8, 0  ;;  %p234_p11 = scmp.lt.s32.totalorder %s385_s8, 63  ;;  %v70_v6 = vadd.f32 %v69_v5, %v61_v4 }
  0x1b   : > { %s469_s19 = smov (!%p229_p9, %s74_s19), 63  ;;  %s90_s27 = sld [smem:[#allocation4 + %s89_s9]] }
  0x1c   : > { %s471_s8 = smov (!%p82_p10, %s385_s8), 0  ;;  %s77_s26 = scalar_lea.vmem %s448_s2, %s469_s19 }
  0x1d   : > { %s473_s8 = smov (!%p234_p11, %s471_s8), 63  ;;  %s98_s28 = sadd.s32 7, %s375_s23  ;;  %v78_v7 = vld [vmem:[%s77_s26] sm:$0x1] }
  0x1e   : > { %s99_s30 = sld [smem:[#allocation4 + %s98_s28]]  ;;  %s86_s6 = scalar_lea.vmem %s448_s2, %s473_s8  ;;  %v79_v8 = vadd.f32 %v78_v7, %v70_v6 }
  0x1f   : > { %v87_v9 = vld [vmem:[%s86_s6] sm:$0x1]  ;;  %s33_s22 = sadd.s32 1, %s331_s22  }
  0x20   : > { %v88_v10 = vadd.f32 %v87_v9, %v79_v8  ;;  %p30_p2 = scmp.ge.s32.totalorder %s33_s22, 2  }
  0x21   : > { %p91_p12 = scmp.gt.s32.totalorder %s90_s27, 0  ;;  %p239_p13 = scmp.lt.s32.totalorder %s90_s27, 63  ;;  %v110_v15 = vld [vmem:[%s447_s1] sm:$0x3] (%p30_p2)  ;;  %v135_v16 = vld [vmem:[%s449_s3 + $0x18] sm:$0xff] (%p30_p2)  ;;  %v134_v17 = vld [vmem:[%s449_s3 + $0x10] sm:$0xff] (%p30_p2) }
  0x22   :  { %v334_v18 = vmov (%p30_p2), 0   ;;  %279 = vrcp.f32 (%p30_p2), %v110_v15  ;;  %156 = vmatpush.msra.mxu0 (%p30_p2), %v135_v16  ;;  %v133_v19 = vld [vmem:[%s449_s3 + $0x8] sm:$0xff] (%p30_p2)  ;;  %v122_v22 = vand.u32 (%p30_p2), 2147483648, %v110_v15  ;;  %vm116_vm1 = vweird.f32 (%p30_p2), %v110_v15  ;;  %v132_v30 = vld [vmem:[%s449_s3] sm:$0xff] (%p30_p2)  ;;  %s335_s3 = smov (%p30_p2), [#allocation5]  }
  0x23   : > { %s475_s27 = smov (!%p91_p12, %s90_s27), 0  ;;  %277 = vset.pattern.permute.xlu0 (%p30_p2), %v334_v18  ;;  %v120_v24 = vand.u32 (%p30_p2), 2147483647, %v110_v15  ;;  %vm140_vm5 = vcmask (%p30_p2), 261120   ;;  %v278_v34 = vld [vmem:[%s450_s4] ss:$0 sm:$0xff] (%p30_p2) }
  0x24   : > { %p100_p0 = scmp.gt.s32.totalorder %s99_s30, 0  ;;  %p244_p1 = scmp.lt.s32.totalorder %s99_s30, 63  ;;  %157 = vmatpush.msra.mxu0 (%p30_p2), %v134_v17  ;;  %v123_v26 = vor.u32 (%p30_p2), 1.1754944e-38, %v122_v22  ;;  %vm164_vm6 = vcmask (%p30_p2), 1041408  }
  0x25   : > { %s477_s27 = smov (!%p239_p13, %s475_s27), 63  ;;  %vm121_vm4 = vcmp.eq.f32.partialorder (%p30_p2), %v120_v24, 8.507059e+37  ;;  %s183_s24 = sshll.u32 (%p30_p2), %s335_s3, 4  ;;  %s184_s24 = int_to_ptr.vmem [resolvable:$true] %s183_s24 }
  0x26   : > { %s479_s30 = smov (!%p100_p0, %s99_s30), 0  ;;  %s95_s23 = scalar_lea.vmem %s448_s2, %s477_s27  ;;  %158 = vmatpush.msra.mxu0 (%p30_p2), %v133_v19 }
  0x27   : > { %v96_v11 = vld [vmem:[%s95_s23] sm:$0x1]  ;;  %s481_s30 = smov (!%p244_p1, %s479_s30), 63  ;;  %s185_s4 = sshll.u32 (%p30_p2), %s451_s5, 4  ;;  %s186_s4 = int_to_ptr.hbm [resolvable:$true] %s185_s4 }
  0x28   : > { %v97_v12 = vadd.f32 %v96_v11, %v88_v10  ;;  %s104_s12 = scalar_lea.vmem %s448_s2, %s481_s30  ;;  %32 = sbr.rel (!%p30_p2) target bundleno = 7 (0x7), region = 52  ;;  %v280_v20 = vpop.eup (%p30_p2), %279  ;;  %159 = vmatpush.msra.mxu0 (%p30_p2), %v132_v30 }
  0x29   : > { %v105_v13 = vld [vmem:[%s104_s12] sm:$0x1]  ;;  %v112_v21 = vmul.f32 (%p30_p2), %v280_v20, %v110_v15  ;;  %vm117_vm2 = vweird.f32 (%p30_p2), %v280_v20 }
  0x2a   : > { %v106_v14 = vadd.f32 %v105_v13, %v97_v12  ;;  %vm118_vm3 = vmor (%p30_p2), %vm116_vm1, %vm117_vm2 }
  0x2b   :  { %v113_v23 = vsub.f32 (%p30_p2), 1.0, %v112_v21 }
  0x2c   : > { %109 = vst.msk [vmem:[%s107_s13] sm:$0x1] %vm108_vm0, %v106_v14 }
  0x2d   :  { %v114_v25 = vmul.f32 %v280_v20, %v113_v23 }
  0x2f   :  { %v115_v27 = vadd.f32 %v280_v20, %v114_v25 }
  0x31   :  { %v119_v28 = vsel %vm118_vm3, %v280_v20, %v115_v27 }
  0x32   :  { %v124_v29 = vsel %vm121_vm4, %v123_v26, %v119_v28 }
  0x33   :  { %128 = vperm.xlu0 %277, %v124_v29   ;;  %v125_v31 = vld [vmem:[#allocation2] sm:$0x3] }
  0xa5   :  { %v129_v32 = vpop.permute.xlu0 %128 }
  0xa6   :  { %v131_v33 = vmul.f32 %v129_v32, %v125_v31 }
  0xa8   :  { %249 = vmatmul.msk.f32.vlgmr.msra.gmra.mxu0 %vm140_vm5, %v131_v33 }
 0x125   :  { %v161_v35 = vpop.f32.mrf.mxu0 }
 0x126   :  { %v162_v36 = vadd.f32 %v278_v34, %v161_v35 }
 0x128   :  { %v165_v37 = vsel %vm164_vm6, %v162_v36, -inf }
 0x129   :  { %166 = vmax.xlane.f32.xlu0 %v165_v37 }
 0x19c   :  { %v167_v38 = vpop.xlane.xlu0 %166 }
 0x19d   :  { %v168_v39 = vsub.f32 %v162_v36, %v167_v38 }
 0x19f   :  { %v169_v40 = vmul.f32 1.442695, %v168_v39 }
 0x1a1   :  { %281 = vpow2.f32 %v169_v40 }
 0x1a7   :  { %v282_v41 = vpop.eup %281 }
 0x1a8   :  { %v171_v42 = vsel %vm164_vm6, %v282_v41, 0.0 }
 0x1a9   :  { %172 = vadd.xlane.f32.xlu1 %v171_v42 }
 0x21c   :  { %v173_v43 = vpop.xlane.xlu1 %172 }
 0x21d   :  { %283 = vlog2.f32 %v173_v43 }
 0x223   :  { %v284_v44 = vpop.eup %283 }
 0x224   :  { %v175_v45 = vmul.f32 0.6931472, %v284_v44 }
 0x226   :  { %v176_v46 = vsub.f32 %v168_v39, %v175_v45 }
 0x228   :  { %177 = vst [vmem:[#allocation5] sm:$0x3] %v176_v46 }
 0x229   :  { %188 = dma.vmem_to_hbm [thread:$0]  %s184_s24, 32, %s186_s4, [#allocation6]  }
 0x22a   :  { %327 = dma.done.wait [#allocation6], 32  }
 0x22b   :  { %328 = vsyncadd [#allocation6], 4294967264 }
 0x22c   :  { %193 = vsyncpa [#allocation6], 1 }

</bundles_post_ra>
